<compile_context>
chip_gen: v7x
topology: tpu7x:2x2x1
jax: 0.10.0
libtpu: 0.0.40
codegen_flags: <defaults>
</compile_context>

<pallas_src>
import functools

import jax
import jax.numpy as jnp
from jax.experimental import pallas as pl
from jax.experimental.pallas import tpu as pltpu


def _basic_conv_kernel(x_ref, w_ref, b_ref, o_ref, *, apply_relu):
    # x_ref: (1, Hp, Wp*Cin)        bf16  full padded image for batch n (resident per n)
    # w_ref: (KH, Wp*Cin, Wo*Cout)  bf16  block-Toeplitz weights, BN scale folded in
    # b_ref: (1, Wo*Cout)           f32   folded BN bias, tiled across Wo
    # o_ref: (1, TILE_H, Wo*Cout)   f32   one row-tile of the output (lane-dense)
    kh = w_ref.shape[0]
    tile_h = o_ref.shape[1]
    lanes = o_ref.shape[2]

    # Row window [h0, h0 + tile_h + KH - 1): aligned dynamic start (h0 is a
    # multiple of tile_h=8), then cheap static sublane shifts per ki.
    h0 = pl.multiple_of(pl.program_id(1) * tile_h, tile_h)
    xwin = x_ref[0, pl.ds(h0, tile_h + kh - 1), :]          # (tile_h+KH-1, Wp*Cin)

    acc = jnp.zeros((tile_h, lanes), jnp.float32)
    for ki in range(kh):                                    # KH matmuls, K = Wp*Cin
        acc += jnp.dot(xwin[ki:ki + tile_h, :], w_ref[ki],
                       preferred_element_type=jnp.float32)

    y = acc + b_ref[...]
    if apply_relu:
        y = jnp.maximum(y, 0.0)
    o_ref[...] = y.reshape(o_ref.shape).astype(o_ref.dtype)


@functools.partial(
    jax.jit,
    static_argnames=("padding", "stride", "dilation", "groups", "relu", "bn"))
def basic_conv(x_nchw, weight_oihw, gamma, beta, running_mean, running_var,
               *, padding=1, stride=1, dilation=1, groups=1,
               relu=True, bn=True, eps=1e-5):
    """BasicConv forward: Conv2d(bias=False) -> BatchNorm2d(eval) -> ReLU.

    x_nchw:      (N, Cin, H, W)   float32
    weight_oihw: (Cout, Cin, KH, KW)
    Returns NCHW float32, matching the PyTorch module.
    """
    N, Cin, H, W = x_nchw.shape
    Cout, Cin_w, KH, KW = weight_oihw.shape
    assert stride == 1 and dilation == 1 and groups == 1, (
        "Pallas BasicConv kernel supports stride=1, dilation=1, groups=1 only")
    assert Cin_w == Cin

    Hp, Wp = H + 2 * padding, W + 2 * padding
    Ho, Wo = Hp - KH + 1, Wp - KW + 1

    # ---- fold BatchNorm (inference) into the weights + a bias vector ----
    if bn:
        scale = gamma / jnp.sqrt(running_var + eps)            # (Cout,)
        bias = beta - running_mean * scale                     # (Cout,)
    else:
        scale = jnp.ones((Cout,), jnp.float32)
        bias = jnp.zeros((Cout,), jnp.float32)

    w_hwio = jnp.transpose(weight_oihw, (2, 3, 1, 0))          # (KH, KW, Cin, Cout)
    w_fold = (w_hwio * scale).astype(jnp.float32)              # BN scale folded in

    # ---- block-Toeplitz weights (KH, Wp*Cin, Wo*Cout):
    # wt[ki, wj*Cin+ci, w*Cout+co] = w_fold[ki, wj-w, ci, co] for 0 <= wj-w < KW
    wt = jnp.zeros((KH, Wp, Cin, Wo, Cout), jnp.float32)
    for w in range(Wo):
        wt = wt.at[:, w:w + KW, :, w, :].set(w_fold)
    wt = wt.reshape(KH, Wp * Cin, Wo * Cout).astype(jnp.bfloat16)

    bias_t = jnp.tile(bias.astype(jnp.float32), (Wo,)).reshape(1, Wo * Cout)

    # ---- input: NCHW -> padded NHWC with channels folded into the lane axis ----
    x_nhwc = jnp.transpose(x_nchw, (0, 2, 3, 1))
    x_pad = jnp.pad(x_nhwc,
                    ((0, 0), (padding, padding), (padding, padding), (0, 0)))
    x2 = x_pad.reshape(N, Hp, Wp * Cin).astype(jnp.bfloat16)

    tile_h = 8 if Ho % 8 == 0 else Ho
    grid = (N, Ho // tile_h)

    out = pl.pallas_call(
        functools.partial(_basic_conv_kernel, apply_relu=relu),
        out_shape=jax.ShapeDtypeStruct((N, Ho, Wo * Cout), jnp.float32),
        grid_spec=pltpu.PrefetchScalarGridSpec(
            num_scalar_prefetch=0,
            grid=grid,
            in_specs=[
                pl.BlockSpec((1, Hp, Wp * Cin), lambda n, h: (n, 0, 0)),
                pl.BlockSpec((KH, Wp * Cin, Wo * Cout), lambda n, h: (0, 0, 0)),
                pl.BlockSpec((1, Wo * Cout), lambda n, h: (0, 0)),
            ],
            out_specs=pl.BlockSpec((1, tile_h, Wo * Cout),
                                   lambda n, h: (n, h, 0)),
        ),
        compiler_params=pltpu.CompilerParams(
            dimension_semantics=("parallel", "parallel")),
    )(x2, wt, bias_t)

    # (N, Ho, Wo*Cout) -> (N, Ho, Wo, Cout) -> NCHW
    return jnp.transpose(out.reshape(N, Ho, Wo, Cout), (0, 3, 1, 2))


def _reference(x, weight, gamma, beta, mean, var, padding, eps=1e-5):
    # Same math as the module, with operands quantized to bf16 exactly like the
    # kernel does (accumulation stays f32), so the comparison is tight.
    scale = gamma / jnp.sqrt(var + eps)
    bias = beta - mean * scale
    w_fold = weight * scale[:, None, None, None]
    xq = x.astype(jnp.bfloat16).astype(jnp.float32)
    wq = w_fold.astype(jnp.bfloat16).astype(jnp.float32)
    y = jax.lax.conv_general_dilated(
        xq, wq, window_strides=(1, 1),
        padding=[(padding, padding), (padding, padding)],
        dimension_numbers=("NCHW", "OIHW", "NCHW"))
    return jnp.maximum(y + bias[None, :, None, None], 0.0)


if __name__ == "__main__":
    # BasicConv(in_planes=4, out_planes=8, kernel_size=3, stride=1, padding=1)
    N, Cin, H, W = 2, 4, 16, 16
    Cout, KH, KW = 8, 3, 3
    pad = 1

    key = jax.random.PRNGKey(0)
    kx, kw, kg, kb, km, kv = jax.random.split(key, 6)

    x = jax.random.normal(kx, (N, Cin, H, W), jnp.float32)
    weight = jax.random.normal(kw, (Cout, Cin, KH, KW), jnp.float32) * 0.1
    gamma = 1.0 + 0.1 * jax.random.normal(kg, (Cout,), jnp.float32)
    beta = 0.1 * jax.random.normal(kb, (Cout,), jnp.float32)
    running_mean = 0.1 * jax.random.normal(km, (Cout,), jnp.float32)
    running_var = jnp.abs(jax.random.normal(kv, (Cout,), jnp.float32)) + 0.5

    out = basic_conv(x, weight, gamma, beta, running_mean, running_var,
                     padding=pad)
    out = jax.block_until_ready(out)

    ref = _reference(x, weight, gamma, beta, running_mean, running_var, pad)
    assert out.shape == (N, Cout, H, W), out.shape
    err = float(jnp.max(jnp.abs(out - ref)))
    assert jnp.allclose(out, ref, atol=2e-3, rtol=2e-3), err

    print("KERNEL_OK")
</pallas_src>

<mosaic_0001>
module attributes {stable_mosaic.version = 11 : i64} {
  func.func @_basic_conv_kernel(%arg0: i32, %arg1: i32, %arg2: memref<1x18x72xbf16, #tpu.memory_space<vmem>>, %arg3: memref<3x72x128xbf16, #tpu.memory_space<vmem>>, %arg4: memref<1x128xf32, #tpu.memory_space<vmem>>, %arg5: memref<1x8x128xf32, #tpu.memory_space<vmem>>) attributes {dimension_semantics = [#tpu.dimension_semantics<parallel>, #tpu.dimension_semantics<parallel>], iteration_bounds = array<i64: 2, 2>, scalar_prefetch = 0 : i64, scratch_operands = 0 : i64, tpu.core_type = #tpu.core_type<tc>, window_params = [{transform_indices = @transform_0, window_bounds = array<i64: 1, 18, 72>}, {pipeline_mode = #tpu.pipeline_mode<synchronous>, transform_indices = @transform_1, window_bounds = array<i64: 3, 72, 128>}, {pipeline_mode = #tpu.pipeline_mode<synchronous>, transform_indices = @transform_2, window_bounds = array<i64: 1, 128>}, {transform_indices = @transform_3, window_bounds = array<i64: 1, 8, 128>}]} {
    %c8_i32 = arith.constant 8 : i32
    %0 = arith.muli %arg1, %c8_i32 : i32
    %1 = tpu.assume_multiple %0, 8 : i32
    %c0 = arith.constant 0 : index
    %2 = arith.index_cast %1 : i32 to index
    %c0_0 = arith.constant 0 : index
    %3 = vector.load %arg2[%c0, %2, %c0_0] : memref<1x18x72xbf16, #tpu.memory_space<vmem>>, vector<1x10x72xbf16>
    %4 = vector.shape_cast %3 : vector<1x10x72xbf16> to vector<10x72xbf16>
    %cst = arith.constant 0.000000e+00 : f32
    %5 = vector.broadcast %cst : f32 to vector<8x128xf32>
    %6 = vector.extract_strided_slice %4 {offsets = [0, 0], sizes = [8, 72], strides = [1, 1]} : vector<10x72xbf16> to vector<8x72xbf16>
    %c0_1 = arith.constant 0 : index
    %c0_2 = arith.constant 0 : index
    %c0_3 = arith.constant 0 : index
    %7 = vector.load %arg3[%c0_1, %c0_2, %c0_3] : memref<3x72x128xbf16, #tpu.memory_space<vmem>>, vector<1x72x128xbf16>
    %8 = vector.shape_cast %7 : vector<1x72x128xbf16> to vector<72x128xbf16>
    %cst_4 = arith.constant dense<0.000000e+00> : vector<8x128xf32>
    %9 = tpu.matmul %6, %8, %cst_4 {dimension_numbers = #tpu.dot_dimension_numbers<[1], [0], [0], [1], [0, 0, 1, 1], [], []>} : vector<8x72xbf16>, vector<72x128xbf16>, vector<8x128xf32> -> vector<8x128xf32>
    %10 = arith.addf %5, %9 : vector<8x128xf32>
    %11 = vector.extract_strided_slice %4 {offsets = [1, 0], sizes = [8, 72], strides = [1, 1]} : vector<10x72xbf16> to vector<8x72xbf16>
    %c1 = arith.constant 1 : index
    %c0_5 = arith.constant 0 : index
    %c0_6 = arith.constant 0 : index
    %12 = vector.load %arg3[%c1, %c0_5, %c0_6] : memref<3x72x128xbf16, #tpu.memory_space<vmem>>, vector<1x72x128xbf16>
    %13 = vector.shape_cast %12 : vector<1x72x128xbf16> to vector<72x128xbf16>
    %cst_7 = arith.constant dense<0.000000e+00> : vector<8x128xf32>
    %14 = tpu.matmul %11, %13, %cst_7 {dimension_numbers = #tpu.dot_dimension_numbers<[1], [0], [0], [1], [0, 0, 1, 1], [], []>} : vector<8x72xbf16>, vector<72x128xbf16>, vector<8x128xf32> -> vector<8x128xf32>
    %15 = arith.addf %10, %14 : vector<8x128xf32>
    %16 = vector.extract_strided_slice %4 {offsets = [2, 0], sizes = [8, 72], strides = [1, 1]} : vector<10x72xbf16> to vector<8x72xbf16>
    %c2 = arith.constant 2 : index
    %c0_8 = arith.constant 0 : index
    %c0_9 = arith.constant 0 : index
    %17 = vector.load %arg3[%c2, %c0_8, %c0_9] : memref<3x72x128xbf16, #tpu.memory_space<vmem>>, vector<1x72x128xbf16>
    %18 = vector.shape_cast %17 : vector<1x72x128xbf16> to vector<72x128xbf16>
    %cst_10 = arith.constant dense<0.000000e+00> : vector<8x128xf32>
    %19 = tpu.matmul %16, %18, %cst_10 {dimension_numbers = #tpu.dot_dimension_numbers<[1], [0], [0], [1], [0, 0, 1, 1], [], []>} : vector<8x72xbf16>, vector<72x128xbf16>, vector<8x128xf32> -> vector<8x128xf32>
    %20 = arith.addf %15, %19 : vector<8x128xf32>
    %c0_11 = arith.constant 0 : index
    %c0_12 = arith.constant 0 : index
    %21 = vector.load %arg4[%c0_11, %c0_12] : memref<1x128xf32, #tpu.memory_space<vmem>>, vector<1x128xf32>
    %22 = vector.broadcast %21 : vector<1x128xf32> to vector<8x128xf32>
    %23 = arith.addf %20, %22 : vector<8x128xf32>
    %cst_13 = arith.constant 0.000000e+00 : f32
    %24 = vector.broadcast %cst_13 : f32 to vector<8x128xf32>
    %25 = arith.maximumf %23, %24 : vector<8x128xf32>
    %26 = vector.shape_cast %25 : vector<8x128xf32> to vector<1x8x128xf32>
    %c0_14 = arith.constant 0 : index
    %c0_15 = arith.constant 0 : index
    %c0_16 = arith.constant 0 : index
    %27 = vector.load %arg5[%c0_14, %c0_15, %c0_16] : memref<1x8x128xf32, #tpu.memory_space<vmem>>, vector<1x8x128xf32>
    tpu.vector_store %arg5[%c0_14, %c0_15, %c0_16], %26 {strides = array<i32>} : memref<1x8x128xf32, #tpu.memory_space<vmem>>, vector<1x8x128xf32>,
    return
  }
  func.func @transform_0(%arg0: i32, %arg1: i32) -> (i32, i32, i32) {
    %c0_i32 = arith.constant 0 : i32
    %c0_i32_0 = arith.constant 0 : i32
    %c0_i32_1 = arith.constant 0 : i32
    return %arg0, %c0_i32, %c0_i32_0 : i32, i32, i32
  }
  func.func @transform_1(%arg0: i32, %arg1: i32) -> (i32, i32, i32) {
    %c0_i32 = arith.constant 0 : i32
    %c0_i32_0 = arith.constant 0 : i32
    %c0_i32_1 = arith.constant 0 : i32
    %c0_i32_2 = arith.constant 0 : i32
    return %c0_i32, %c0_i32_0, %c0_i32_1 : i32, i32, i32
  }
  func.func @transform_2(%arg0: i32, %arg1: i32) -> (i32, i32) {
    %c0_i32 = arith.constant 0 : i32
    %c0_i32_0 = arith.constant 0 : i32
    %c0_i32_1 = arith.constant 0 : i32
    return %c0_i32, %c0_i32_0 : i32, i32
  }
  func.func @transform_3(%arg0: i32, %arg1: i32) -> (i32, i32, i32) {
    %c0_i32 = arith.constant 0 : i32
    %c0_i32_0 = arith.constant 0 : i32
    return %arg0, %arg1, %c0_i32 : i32, i32, i32
  }
}

</mosaic_0001>

<bundles_post_ra>
// kernel: tile.8
= control target key start
LH: loop header
LB: loop body
LE: loop exit
PB: predicated region body
PF: predicated region fallthrough
CT: control target
= control target key end

     0   :  { %s28_s0 = inlined_call_operand.vmem [shape: f32[8], index: 0, kind: input, shape index: {}]   ;;  %s29_s1 = inlined_call_operand.vmem [shape: f32[16,8], index: 1, kind: output, shape index: {}]  }
   0x1   :  { %v4_v0 = vld [vmem:[%s28_s0] ss:$0 sm:$0xff] }
   0x2   :  { %5 = vst [vmem:[%s29_s1] sm:$0xff] %v4_v0  ;;  %8 = vst [vmem:[%s29_s1 + $0x8] sm:$0xff] %v4_v0 }

// kernel: tile.9
= control target key start
LH: loop header
LB: loop body
LE: loop exit
PB: predicated region body
PF: predicated region fallthrough
CT: control target
= control target key end

     0   :  { %s131_s10 = smov 120   ;;  %s132_s11 = smov 104   ;;  %vm3_vm0 = vcmask 64512   ;;  %vm9_vm1 = vcmask 1048512   ;;  %vm15_vm2 = vcmask 982912   ;;  %vm21_vm3 = vcmask 917312   ;;  %s207_s0 = inlined_call_operand.vmem [shape: f32[16,8], index: 0, kind: input, shape index: {}]   ;;  %s208_s1 = inlined_call_operand.vmem [shape: f32[1,128], index: 1, kind: output, shape index: {}]  }
   0x1   :  { %v101_v0 = vld [vmem:[%s207_s0 + $0xf] sm:$0x1]   ;;  %v103_v1 = vld [vmem:[%s207_s0 + $0xd] sm:$0x1]   ;;  %v102_v2 = vld [vmem:[%s207_s0 + $0xe] sm:$0x1]  }
   0x2   :  { %7 = vrot.lane.b32.xlu0 %v101_v0, %s131_s10  ;;  %19 = vrot.lane.b32.xlu1 %v103_v1, %s132_s11  ;;  %v104_v3 = vld [vmem:[%s207_s0 + $0xc] sm:$0x1]   ;;  %s133_s16 = smov 112   ;;  %s134_s17 = smov 96   ;;  %v105_v4 = vld [vmem:[%s207_s0 + $0xb] sm:$0x1]  }
   0x3   :  { %v106_v5 = vld [vmem:[%s207_s0 + $0xa] sm:$0x1]   ;;  %v2_v6 = vld [vmem:[%s207_s0] sm:$0x1]   ;;  %s135_s24 = smov 88   ;;  %s136_s25 = smov 80  }
   0x4   :  { %4 = vst.msk [vmem:[#allocation0] sm:$0x1] %vm3_vm0, %v2_v6   ;;  %v107_v7 = vld [vmem:[%s207_s0 + $0x9] sm:$0x1]   ;;  %v108_v8 = vld [vmem:[%s207_s0 + $0x8] sm:$0x1]  }
   0x5   :  { %s137_s30 = smov 72   ;;  %s138_s2 = smov 64   ;;  %v109_v9 = vld [vmem:[%s207_s0 + $0x7] sm:$0x1]   ;;  %v110_v10 = vld [vmem:[%s207_s0 + $0x6] sm:$0x1]  }
   0x6   :  { %13 = vrot.lane.b32.xlu0 %v102_v2, %s133_s16  ;;  %25 = vrot.lane.b32.xlu1 %v104_v3, %s134_s17  ;;  %s139_s7 = smov 56   ;;  %s140_s8 = smov 48   ;;  %v111_v11 = vld [vmem:[%s207_s0 + $0x5] sm:$0x1]   ;;  %v112_v12 = vld [vmem:[%s207_s0 + $0x4] sm:$0x1]  }
   0x7   :  { %s141_s13 = smov 40   ;;  %s142_s14 = smov 32   ;;  %v113_v13 = vld [vmem:[%s207_s0 + $0x3] sm:$0x1]   ;;  %v114_v14 = vld [vmem:[%s207_s0 + $0x2] sm:$0x1]  }
   0x8   :  { %s143_s19 = smov 24   ;;  %s144_s20 = smov 16   ;;  %v115_v15 = vld [vmem:[%s207_s0 + $0x1] sm:$0x1]   ;;  %vm27_vm4 = vcmask 851712   ;;  %vm33_vm5 = vcmask 786112  }
   0x9   :  { %s145_s0 = smov 8   ;;  %vm39_vm6 = vcmask 720512   ;;  %vm45_vm7 = vcmask 654912   ;;  %vm51_vm8 = vcmask 589312   ;;  %vm57_vm9 = vcmask 523712  }
   0xa   :  { %31 = vrot.lane.b32.xlu0 %v105_v4, %s135_s24  ;;  %37 = vrot.lane.b32.xlu1 %v106_v5, %s136_s25  ;;  %vm63_vm10 = vcmask 458112   ;;  %vm69_vm11 = vcmask 392512   ;;  %vm75_vm12 = vcmask 326912   ;;  %vm81_vm13 = vcmask 261312  }
   0xb   :  { %vm87_vm14 = vcmask 195712   ;;  %vm93_vm15 = vcmask 130112  }
   0xe   :  { %43 = vrot.lane.b32.xlu0 %v107_v7, %s137_s30  ;;  %49 = vrot.lane.b32.xlu1 %v108_v8, %s138_s2 }
  0x12   :  { %55 = vrot.lane.b32.xlu0 %v109_v9, %s139_s7  ;;  %61 = vrot.lane.b32.xlu1 %v110_v10, %s140_s8 }
  0x16   :  { %67 = vrot.lane.b32.xlu0 %v111_v11, %s141_s13  ;;  %73 = vrot.lane.b32.xlu1 %v112_v12, %s142_s14 }
  0x1a   :  { %79 = vrot.lane.b32.xlu0 %v113_v13, %s143_s19  ;;  %85 = vrot.lane.b32.xlu1 %v114_v14, %s144_s20 }
  0x1e   :  { %91 = vrot.lane.b32.xlu0 %v115_v15, %s145_s0 }
  0x74   :  { %v8_v16 = vpop.permute.xlu0 %7   ;;  %v20_v17 = vpop.permute.xlu1 %19  }
  0x75   :  { %10 = vst.msk [vmem:[#allocation0] sm:$0x1] %vm9_vm1, %v8_v16  }
  0x78   :  { %v14_v18 = vpop.permute.xlu0 %13   ;;  %v26_v19 = vpop.permute.xlu1 %25  }
  0x79   :  { %16 = vst.msk [vmem:[#allocation0] sm:$0x1] %vm15_vm2, %v14_v18  }
  0x7a   :  { %22 = vst.msk [vmem:[#allocation0] sm:$0x1] %vm21_vm3, %v20_v17  }
  0x7b   :  { %28 = vst.msk [vmem:[#allocation0] sm:$0x1] %vm27_vm4, %v26_v19  }
  0x7c   :  { %v32_v20 = vpop.permute.xlu0 %31   ;;  %v38_v21 = vpop.permute.xlu1 %37  }
  0x7d   :  { %34 = vst.msk [vmem:[#allocation0] sm:$0x1] %vm33_vm5, %v32_v20  }
  0x7e   :  { %40 = vst.msk [vmem:[#allocation0] sm:$0x1] %vm39_vm6, %v38_v21  }
  0x80   :  { %v44_v22 = vpop.permute.xlu0 %43   ;;  %v50_v23 = vpop.permute.xlu1 %49  }
  0x81   :  { %46 = vst.msk [vmem:[#allocation0] sm:$0x1] %vm45_vm7, %v44_v22  }
  0x82   :  { %52 = vst.msk [vmem:[#allocation0] sm:$0x1] %vm51_vm8, %v50_v23  }
  0x84   :  { %v56_v24 = vpop.permute.xlu0 %55   ;;  %v62_v25 = vpop.permute.xlu1 %61  }
  0x85   :  { %58 = vst.msk [vmem:[#allocation0] sm:$0x1] %vm57_vm9, %v56_v24  }
  0x86   :  { %64 = vst.msk [vmem:[#allocation0] sm:$0x1] %vm63_vm10, %v62_v25  }
  0x88   :  { %v68_v26 = vpop.permute.xlu0 %67   ;;  %v74_v27 = vpop.permute.xlu1 %73  }
  0x89   :  { %70 = vst.msk [vmem:[#allocation0] sm:$0x1] %vm69_vm11, %v68_v26  }
  0x8a   :  { %76 = vst.msk [vmem:[#allocation0] sm:$0x1] %vm75_vm12, %v74_v27  }
  0x8c   :  { %v80_v28 = vpop.permute.xlu0 %79   ;;  %v86_v29 = vpop.permute.xlu1 %85  }
  0x8d   :  { %82 = vst.msk [vmem:[#allocation0] sm:$0x1] %vm81_vm13, %v80_v28  }
  0x8e   :  { %88 = vst.msk [vmem:[#allocation0] sm:$0x1] %vm87_vm14, %v86_v29  }
  0x90   :  { %v92_v30 = vpop.permute.xlu0 %91  }
  0x91   :  { %94 = vst.msk [vmem:[#allocation0] sm:$0x1] %vm93_vm15, %v92_v30  }
  0x98   :  { %v98_v31 = vld [vmem:[#allocation0] sm:$0x1] }
  0x99   :  { %100 = vst [vmem:[%s208_s1] sm:$0x1] %v98_v31 }

// kernel: basic_conv.1
= control target key start
LH: loop header
LB: loop body
LE: loop exit
PB: predicated region body
PF: predicated region fallthrough
CT: control target
= control target key end

     0   :  { %s786_s12 = smov 0   ;;  %s788_s13 = smov 0   ;;  %s925_s0 = inlined_call_operand.vmem [shape: bf16[2,18,72], index: 0, kind: input, shape index: {}]   ;;  %s926_s1 = inlined_call_operand.vmem [shape: bf16[3,72,128], index: 1, kind: input, shape index: {}]   ;;  %s927_s2 = inlined_call_operand.vmem [shape: f32[1,128], index: 2, kind: input, shape index: {}]   ;;  %s928_s3 = inlined_call_operand.vmem [shape: f32[2,16,128], index: 3, kind: output, shape index: {}]  }
   0x1   :  { %s790_s14 = smov 0   ;;  %s792_s15 = smov 0  }
   0x2   :  { %s794_s16 = smov 0  }
   0x3 LB: > { %s22_s17 = sadd.s32 1, %s754_s14  ;;  %s25_s18 = sadd.s32 1, %s758_s15  ;;  %s762_s16 = sphi %s794_s16, %s13_s16   ;;  %s758_s15 = sphi %s792_s15, %s932_s15   ;;  %s754_s14 = sphi %s790_s14, %s931_s14   ;;  %s750_s13 = sphi %s788_s13, %s930_s13   ;;  %s746_s12 = sphi %s786_s12, %s929_s12  }
   0x4   : > { %p23_p0 = scmp.ge.s32.totalorder %s22_s17, 2  ;;  %p559_p1 = scmp.ge.s32.totalorder %s762_s16, 1 }
   0x5   : > { %p151_p2 = scmp.lt.s32.totalorder %s762_s16, 5 }
   0x6   : > { %s934_s17 = smov (%p23_p0, %s22_s17), 0  ;;  %s936_s18 = smov (!%p23_p0, %s25_s18), %s758_s15 }
   0x7   : > { %p152_p3 = pnand %p559_p1, %p151_p2  ;;  %p27_p4 = scmp.ge.s32.totalorder %s936_s18, 2 }
   0x8   : > { %v708_v0 = vld [vmem:[%s926_s1 + $0x24] sm:$0xff] (!%p152_p3)   ;;  %v764_v1 = vmov (!%p152_p3), 0.0   ;;  %v710_v3 = vld [vmem:[%s926_s1 + $0x2c] sm:$0xff] (!%p152_p3)   ;;  %p178_p5 = scmp.lt.s32.totalorder (!%p152_p3), %s750_s13, 1  ;;  %vm765_vm0 = vmmov (!%p152_p3), 0   ;;  %s563_s27 = sshll.u32 (!%p152_p3), %s746_s12, 3 }
   0x9   : > { %s938_s18 = smov (%p27_p4, %s936_s18), 0  ;;  %155 = sbr.rel (%p152_p3) target bundleno = 269 (0x10d), region = 32 }
   0xa   : > { %623 = vmatprep.subr.bf16.mxu0 (!%p152_p3), %v764_v1  ;;  %637 = vmatprep.subr.bf16.mxu1 (!%p152_p3), %v764_v1  ;;  %v709_v2 = vld [vmem:[%s926_s1] sm:$0xff] (!%p152_p3)   ;;  %v711_v4 = vld [vmem:[%s926_s1 + $0x8] sm:$0xff] (!%p152_p3)   ;;  %v712_v5 = vld [vmem:[%s926_s1 + $0x34] sm:$0xff] (!%p152_p3)   ;;  %s193_s30 = sshra.s32 (!%p152_p3), %s563_s27, 3  ;;  %vm261_vm1 = vcmask (!%p152_p3), 1043456   ;;  %vm257_vm2 = vcmask (!%p152_p3), 588800  }
   0xb   : > { %624 = vmatpush3.bf16.msra.mxu0 (!%p152_p3), %v708_v0  ;;  %638 = vmatpush3.bf16.msra.mxu1 (!%p152_p3), %v709_v2  ;;  %v713_v6 = vld [vmem:[%s926_s1 + $0x10] sm:$0xff] (!%p152_p3)   ;;  %v714_v7 = vld [vmem:[%s926_s1 + $0x3c] sm:$0xff] (!%p152_p3)   ;;  %s564_s21 = sshll.u32 (!%p152_p3), %s193_s30, 2  ;;  %v716_v9 = vld [vmem:[%s926_s1 + $0x44] ss:$0 sps:$4 sm:$0xff] (!%p152_p3)   ;;  %p185_p6 = scmp.lt.s32.totalorder (!%p152_p3), %s746_s12, 1 }
   0xc   : > { %625 = vmatprep.subr.bf16.mxu0 (!%p152_p3), %v764_v1  ;;  %639 = vmatprep.subr.bf16.mxu1 (!%p152_p3), %v764_v1  ;;  %v715_v8 = vld [vmem:[%s926_s1 + $0x18] sm:$0xff] (!%p152_p3)   ;;  %v717_v10 = vld [vmem:[%s926_s1 + $0x20] ss:$0 sps:$4 sm:$0xff] (!%p152_p3)   ;;  %v263_v16 = vsel (!%p152_p3), %vm261_vm1, %v716_v9, 0  ;;  %v719_v20 = vld [vmem:[%s926_s1 + $0x48] sm:$0xff] (!%p152_p3)  }
   0xd   : > { %633 = vmatprep.mubr.msk.bf16.mxu0 (!%p152_p3), %vm765_vm0, %v764_v1  ;;  %647 = vmatprep.mubr.msk.bf16.mxu1 (!%p152_p3), %vm765_vm0, %v764_v1  ;;  %v336_v17 = vsel (!%p152_p3), %vm261_vm1, %v717_v10, 0  ;;  %v720_v21 = vld [vmem:[%s926_s1 + $0x50] sm:$0xff] (!%p152_p3)   ;;  %v721_v22 = vld [vmem:[%s926_s1 + $0x58] sm:$0xff] (!%p152_p3)   ;;  %v722_v23 = vld [vmem:[%s926_s1 + $0x60] sm:$0xff] (!%p152_p3)  }
   0xe   : > { %v723_v24 = vld [vmem:[%s926_s1 + $0x68] ss:$0 sps:$4 sm:$0xff] (!%p152_p3)   ;;  %v602_v37 = vld [vmem:[%s927_s2] ss:$0 sm:$0xff] (!%p152_p3) }
   0xf   : > { %626 = vmatpush3.bf16.msra.mxu0 (!%p152_p3), %v710_v3  ;;  %640 = vmatpush3.bf16.msra.mxu1 (!%p152_p3), %v711_v4  ;;  %v420_v25 = vsel (!%p152_p3), %vm261_vm1, %v723_v24, 0 }
  0x10   : > { %s940_s13 = smov (!%p178_p5, %s750_s13), 1  ;;  %627 = vmatprep.subr.bf16.mxu0 %v764_v1  ;;  %641 = vmatprep.subr.bf16.mxu1 %v764_v1  ;;  %s942_s12 = smov (!%p185_p6, %s746_s12), 1 }
  0x11   : > { %s665_s6 = smul.u32 12, %s940_s13  ;;  %s561_s10 = sshll.u32 %s940_s13, 1 }
  0x12   : > { %s188_s11 = sadd.s32 %s561_s10, %s942_s12 }
  0x13   : > { %s182_s20 = scalar_lea.vmem %s925_s0, %s665_s6  ;;  %628 = vmatpush3.bf16.msra.mxu0 %v712_v5  ;;  %642 = vmatpush3.bf16.msra.mxu1 %v713_v6 }
  0x14   : > { %s196_s24 = scalar_lea.vmem %s182_s20, %s564_s21  ;;  %629 = vmatprep.subr.bf16.mxu0 %v764_v1  ;;  %643 = vmatprep.subr.bf16.mxu1 %v764_v1  ;;  %s562_s21 = sshll.u32 %s188_s11, 3 }
  0x15   : > { %v197_v11 = vld [vmem:[%s196_s24] sm:$0xf]  ;;  %v198_v12 = vld [vmem:[%s196_s24 + $0x4] sm:$0x1]  ;;  %s190_s24 = scalar_lea.vmem %s928_s3, %s562_s21 }
  0x16   : > { %v574_v13 = vcombine.low %v197_v11, %v198_v12 }
  0x17   : > { %630 = vmatpush3.bf16.msra.mxu0 %v714_v7  ;;  %644 = vmatpush3.bf16.msra.mxu1 %v715_v8 }
  0x18   : > { %v224_v14 = vshrl.u32 %v574_v13, 16  ;;  %v226_v15 = vshll.u32 %v574_v13, 16  ;;  %631 = vmatprep.subr.bf16.mxu0 %v764_v1  ;;  %645 = vmatprep.subr.bf16.mxu1 %v764_v1  ;;  %v388_v26 = vrot.slane %v574_v13, 1 }
  0x1a   : > { %v228_v18 = vrot.slane %v226_v15, 1 }
  0x1b   : > { %632 = vmatpush3.bf16.msra.mxu0 %v263_v16  ;;  %646 = vmatpush3.bf16.msra.mxu1 %v336_v17 }
  0x1c   : > { %v229_v19 = vor.u32 %v228_v18, %v224_v14  ;;  %651 = vmatprep.subr.bf16.mxu0 %v764_v1 }
  0x1e   : > { %634 = vmatmul.mubr.msk.bf16.vlgmr.msra.gmra.mrb[0].mxu0 %vm257_vm2, %v229_v19  ;;  %648 = vmatmul.mubr.msk.bf16.vlgmr.msra.gmra.mrb[0].mxu1 %vm257_vm2, %v197_v11 }
  0x1f   : > { %652 = vmatpush3.bf16.msra.mxu0 %v719_v20  ;;  %661 = vmatprep.mubr.msk.bf16.mxu0 %vm765_vm0, %v764_v1 }
  0x20   : > { %653 = vmatprep.subr.bf16.mxu0 %v764_v1 }
  0x23   : > { %654 = vmatpush3.bf16.msra.mxu0 %v720_v21 }
  0x24   : > { %655 = vmatprep.subr.bf16.mxu0 %v764_v1 }
  0x27   : > { %656 = vmatpush3.bf16.msra.mxu0 %v721_v22 }
  0x28   : > { %657 = vmatprep.subr.bf16.mxu0 %v764_v1 }
  0x2b   : > { %658 = vmatpush3.bf16.msra.mxu0 %v722_v23 }
  0x2c   : > { %659 = vmatprep.subr.bf16.mxu0 %v764_v1 }
  0x2f   : > { %660 = vmatpush3.bf16.msra.mxu0 %v420_v25 }
  0x32   : > { %662 = vmatmul.mubr.msk.bf16.vlgmr.msra.gmra.mrb[4].mxu0 %vm257_vm2, %v388_v26 }
  0xf1   : > { %v299_v27 = vpop.f32.mrb[0].mxu0  ;;  %v372_v29 = vpop.f32.mrb[0].mxu1 }
  0xf2   : > { %v635_v28 = vpop.f32.mrb[1].mxu0  ;;  %v373_v30 = vadd.f32 %v372_v29, %v299_v27  ;;  %v649_v32 = vpop.f32.mrb[1].mxu1 }
  0xf3   : > { %v302_v31 = vpop.f32.mrb[2].mxu0  ;;  %v375_v34 = vpop.f32.mrb[2].mxu1 }
  0xf4   : > { %v636_v33 = vpop.f32.mrb[3].mxu0  ;;  %v650_v35 = vpop.f32.mrb[3].mxu1 }
 0x105   : > { %v456_v36 = vpop.f32.mrb[4].mxu0 }
 0x106   : > { %v462_v38 = vadd.f32 %v456_v36, %v373_v30  ;;  %v663_v39 = vpop.f32.mrb[5].mxu0 }
 0x107   : > { %v459_v40 = vpop.f32.mrb[6].mxu0 }
 0x108   : > { %v470_v41 = vadd.f32 %v602_v37, %v462_v38  ;;  %v664_v42 = vpop.f32.mrb[7].mxu0 }
 0x10a   : > { %v471_v43 = vmax.f32 %v470_v41, 0.0 }
 0x10c   : > { %472 = vst [vmem:[%s190_s24] sm:$0xff] %v471_v43 }
 0x10d PF: > { %s13_s16 = sadd.s32 1, %s762_s16   ;;  %s929_s12 = smov %s754_s14 }
 0x10e   : > { %p10_p7 = scmp.ge.s32.totalorder %s13_s16, 6   ;;  %s930_s13 = smov %s758_s15 }
 0x10f   : > { %s931_s14 = smov %s934_s17  ;;  %s932_s15 = smov %s938_s18 }
 0x110   :  { %12 = sbr.rel (!%p10_p7) target bundleno = 3 (0x3), region = 65 }

</bundles_post_ra>
